<compile_context>
chip_gen: v6e
topology: v6e:2x2x1
jax: 0.10.0
libtpu: 0.0.40
codegen_flags: <defaults>
</compile_context>

<pallas_src>
import math

import jax
import jax.numpy as jnp
import numpy as np
from jax.experimental import pallas as pl
from jax.experimental.pallas import tpu as pltpu

_MIB = 1024 * 1024


def _round_up(x, m):
    return ((x + m - 1) // m) * m


def _cdiv(a, b):
    return (a + b - 1) // b


def _tpu_defaults():
    """Generation-aware (token tile, vocab tile, scoped-VMEM cap) defaults."""
    kind = ""
    try:
        kind = jax.devices()[0].device_kind.lower()
    except Exception:
        pass
    vmem_phys = 128 * _MIB
    try:
        vmem_phys = int(pltpu.get_tpu_info().vmem_capacity_bytes)
    except Exception:
        pass

    if "v5 lite" in kind or "v5e" in kind or "v5lite" in kind:
        gen, tm, vblock, cap = "v5e", 256, 1024, 96 * _MIB    # 197 TF / 0.82 TB/s
    elif "v7" in kind or "tpu7" in kind:
        gen, tm, vblock, cap = "v7x", 512, 1024, 48 * _MIB    # 64 MiB physical VMEM
    elif "v6" in kind:
        gen, tm, vblock, cap = "v6e", 1024, 1024, 96 * _MIB   # 918 TF / 1.4 TB/s
    else:
        gen, tm, vblock, cap = "unknown", 256, 512, 48 * _MIB
    cap = min(cap, max(int(0.75 * vmem_phys), 32 * _MIB))
    return gen, tm, vblock, cap


# --------------------------------------------------------------------------------------
# Path 1: one-hot x weight-tile MXU matmul (prefill-sized T)
# --------------------------------------------------------------------------------------
def _vocab_embed_matmul_kernel(tile_starts_ref, ids_ref, w_ref, out_ref):
    """One (token tile, fused rank*vocab tile) step of the masked one-hot lookup.

    tile_starts_ref : (R*kv,) int32 SMEM  global vocab id of each weight tile's row 0
    ids_ref         : (tm, 1) int32       global token ids for this token tile
    w_ref           : (vk, D)             one vocab tile of the flattened weight table
    out_ref         : (tm, D)             output tile, accumulated in-place across j
    """
    j = pl.program_id(1)
    tm = ids_ref.shape[0]
    vk = w_ref.shape[0]

    ids = ids_ref[...]                                 # (tm, 1)
    local = ids - tile_starts_ref[j]                   # row index inside this vocab tile
    iota = jax.lax.broadcasted_iota(jnp.int32, (tm, vk), 1)
    # ids outside this tile's range match no column -> all-zero one-hot row -> zero
    # contribution, reproducing `output_parallel[input_mask, :] = 0.0` + all-reduce.
    onehot = (iota == local).astype(w_ref.dtype)       # (tm, vk)

    contrib = jnp.dot(onehot, w_ref[...], preferred_element_type=jnp.float32)

    # Accumulate directly into the weight-dtype output block (no f32 scratch): each
    # token matches exactly one (rank, vocab) tile, every other contribution is exactly
    # 0.0, so bf16 accumulation is lossless and we save tm*D*4 bytes of VMEM + a copy.
    @pl.when(j == 0)
    def _init():
        out_ref[...] = contrib.astype(out_ref.dtype)

    @pl.when(j > 0)
    def _accumulate():
        out_ref[...] += contrib.astype(out_ref.dtype)


def _matmul_vmem_estimate(tm, vk, D, itemsize, weight_bufs):
    return (2 * tm * 128 * 4                      # (tm,1) ids tile, lane-padded, x2 buffers
            + weight_bufs * vk * D * itemsize     # weight tile buffers
            + 2 * tm * D * itemsize               # output tile (accumulator), x2 buffers
            + tm * vk * (4 + itemsize))           # int32 iota + one-hot intermediates


def _forward_matmul(ids_flat, stacked_weights, starts, B, S, R, Vp, D,
                    tm, vocab_block, gen, vmem_cap):
    T = B * S
    w_dtype = stacked_weights.dtype
    itemsize = jnp.dtype(w_dtype).itemsize
    sub = 8 * max(1, 4 // itemsize)               # sublane packing multiple (16 for bf16)

    # --- token tile: clamp to the (128-rounded) token count, keep MXU-row aligned ---
    tm = min(tm, max(128, _round_up(T, 128)))
    if gen == "v7x" and _cdiv(T, tm) == 1 and tm >= 256:
        tm //= 2      # >=2 'parallel' token tiles so both v7x TensorCores are fed

    # --- vocab (reduction) tile: pad Vp instead of the old "one giant tile" fallback ---
    vk = vocab_block if Vp > vocab_block else _round_up(Vp, sub)
    weight_bufs = 3 if gen == "v5e" else 2        # deeper weight buffering on slow-HBM v5e
    budget = int(0.8 * vmem_cap)
    while _matmul_vmem_estimate(tm, vk, D, itemsize, weight_bufs) > budget and \
            (vk > 256 or tm > 256):
        if vk > 256:
            vk = max(256, vk // 2)
        else:
            tm = max(256, tm // 2)
    Vp_pad = _round_up(Vp, vk)
    kv = Vp_pad // vk

    # --- pad & flatten weights: (R, Vp, D) -> (R*Vp_pad, D).  Padded rows are zeros, so
    #     a neighbouring partition's ids that alias into them contribute exactly 0 ---
    w = stacked_weights
    if Vp_pad != Vp:
        w = jnp.pad(w, ((0, 0), (0, Vp_pad - Vp), (0, 0)))
    w_flat = w.reshape(R * Vp_pad, D)

    # --- token padding: sentinel -1 never matches any vocab tile -> zero rows ---
    T_pad = _round_up(T, tm)
    ids_pad = jnp.full((T_pad,), -1, dtype=jnp.int32).at[:T].set(ids_flat)
    ids2d = ids_pad.reshape(T_pad, 1)

    # --- per-tile global start id for the fused (rank, vocab-tile) reduction axis ---
    tile_starts = (jnp.repeat(starts, kv)
                   + jnp.tile(jnp.arange(kv, dtype=jnp.int32) * vk, R)).astype(jnp.int32)

    w_spec_kwargs = {}
    if weight_bufs != 2:
        w_spec_kwargs["pipeline_mode"] = pl.Buffered(weight_bufs)
    try:
        w_spec = pl.BlockSpec((vk, D), lambda i, j, ts: (j, 0), **w_spec_kwargs)
    except TypeError:                              # older BlockSpec without pipeline_mode
        w_spec = pl.BlockSpec((vk, D), lambda i, j, ts: (j, 0))

    out = pl.pallas_call(
        _vocab_embed_matmul_kernel,
        out_shape=jax.ShapeDtypeStruct((T_pad, D), w_dtype),
        grid_spec=pltpu.PrefetchScalarGridSpec(
            num_scalar_prefetch=1,                 # tile_starts -> SMEM
            grid=(T_pad // tm, R * kv),
            in_specs=[
                # ids: block index only depends on i -> DMA'd once per token tile
                pl.BlockSpec((tm, 1), lambda i, j, ts: (i, 0)),
                # one (vk, D) tile of the flattened vocab, streamed over j
                w_spec,
            ],
            out_specs=pl.BlockSpec((tm, D), lambda i, j, ts: (i, 0)),
        ),
        compiler_params=pltpu.CompilerParams(
            # token axis parallel (megacore / v7x 2-TC sharding); the fused rank*vocab
            # axis revisits the output block -> arbitrary, last in the grid.
            dimension_semantics=("parallel", "arbitrary"),
            vmem_limit_bytes=vmem_cap,
        ),
    )(tile_starts, ids2d, w_flat)

    return out[:T].reshape(B, S, D)


# --------------------------------------------------------------------------------------
# Path 2: DMA row gather (decode / short-prefill T)
# --------------------------------------------------------------------------------------
def _vocab_embed_gather_kernel(ids_smem, ids_ref, w_hbm, out_ref, row_buf, sems):
    """Row-gather path: one DMA'd weight row per token (ids scalar-prefetched to SMEM).

    ids_smem : (T_pad,) int32 SMEM    all token ids (drive the DMA source rows)
    ids_ref  : (tg, 1) int32 VMEM     this tile's ids (validity / padding mask)
    w_hbm    : (R*Vp, D) HBM (ANY)    flattened stacked weight table
    out_ref  : (tg, D)                output tile
    row_buf  : (tg, D) VMEM scratch   gathered rows
    sems     : (tg,) DMA semaphores
    """
    i = pl.program_id(0)
    tg = out_ref.shape[0]
    vtot = w_hbm.shape[0]

    def _issue(t, carry):
        gid = ids_smem[i * tg + t]
        row = jnp.minimum(jnp.maximum(gid, 0), vtot - 1)   # clamp padding / OOB ids
        pltpu.make_async_copy(w_hbm.at[row], row_buf.at[t], sems.at[t]).start()
        return carry

    jax.lax.fori_loop(0, tg, _issue, 0, unroll=True)

    def _wait(t, carry):
        pltpu.make_async_copy(w_hbm.at[0], row_buf.at[t], sems.at[t]).wait()
        return carry

    jax.lax.fori_loop(0, tg, _wait, 0, unroll=True)

    ids = ids_ref[...]                                     # (tg, 1)
    valid = (ids >= 0) & (ids < vtot)                      # sentinel / OOB -> zero row
    out_ref[...] = jnp.where(valid, row_buf[...],
                             jnp.zeros_like(row_buf[...])).astype(out_ref.dtype)


def _forward_gather(ids_flat, stacked_weights, B, S, R, Vp, D, tg, vmem_cap):
    T = B * S
    w_dtype = stacked_weights.dtype
    tg = max(8, _round_up(int(tg), 8))
    # contiguous even split -> the flat table IS the global vocabulary, in order
    w_flat = stacked_weights.reshape(R * Vp, D)

    T_pad = _round_up(T, tg)
    ids_pad = jnp.full((T_pad,), -1, dtype=jnp.int32).at[:T].set(ids_flat)
    ids2d = ids_pad.reshape(T_pad, 1)

    out = pl.pallas_call(
        _vocab_embed_gather_kernel,
        out_shape=jax.ShapeDtypeStruct((T_pad, D), w_dtype),
        grid_spec=pltpu.PrefetchScalarGridSpec(
            num_scalar_prefetch=1,                 # ids -> SMEM (drive the row DMAs)
            grid=(T_pad // tg,),
            in_specs=[
                pl.BlockSpec((tg, 1), lambda i, ids: (i, 0)),   # ids (mask) in VMEM
                pl.BlockSpec(memory_space=pl.ANY),              # weight table stays in HBM
            ],
            out_specs=pl.BlockSpec((tg, D), lambda i, ids: (i, 0)),
            scratch_shapes=[
                pltpu.VMEM((tg, D), w_dtype),
                pltpu.SemaphoreType.DMA((tg,)),
            ],
        ),
        compiler_params=pltpu.CompilerParams(
            dimension_semantics=("parallel",),
            vmem_limit_bytes=min(vmem_cap, 64 * _MIB),
        ),
    )(ids_pad, ids2d, w_flat)

    return out[:T].reshape(B, S, D)


# --------------------------------------------------------------------------------------
# Public entry point
# --------------------------------------------------------------------------------------
def vocab_parallel_embedding_forward(ids, stacked_weights, vocab_starts, *,
                                     path="auto", tm=None, vocab_block=None,
                                     gather_rows=8):
    """Fused VocabParallelEmbedding forward over all tensor-parallel ranks.

    ids             : (B, S) int                 global token ids
    stacked_weights : (R, Vp, D)                 per-rank partitions (equal Vp)
    vocab_starts    : (R,) int                   global vocab start of each partition
    path            : "auto" | "matmul" | "gather"
    tm              : matmul-path token tile (None -> generation default)
    vocab_block     : matmul-path vocab tile (None -> generation default)
    gather_rows     : gather-path tokens per grid step (multiple of 8)
    """
    B, S = ids.shape
    R, Vp, D = stacked_weights.shape
    T = B * S

    gen, tm_def, vblock_def, vmem_cap = _tpu_defaults()
    tm = tm_def if tm is None else max(8, _round_up(int(tm), 8))
    vocab_block = vblock_def if vocab_block is None else max(8, _round_up(int(vocab_block), 8))

    starts = vocab_starts.astype(jnp.int32)
    ids_flat = ids.reshape(T).astype(jnp.int32)

    # Contiguous even split (VocabUtility.vocab_range_from_global_vocab_size)?
    contiguous = bool(np.array_equal(np.asarray(vocab_starts).astype(np.int64),
                                     np.arange(R, dtype=np.int64) * Vp))

    if path == "auto":
        # One-hot path re-reads ceil(T/tm)*R*Vp weight rows per pass; gather reads ~T rows.
        eff_tm = min(tm, max(128, _round_up(T, 128)))
        matmul_rows = _cdiv(T, eff_tm) * R * Vp
        path = "gather" if (contiguous and 4 * T < matmul_rows) else "matmul"
    if path == "gather" and not contiguous:
        # TODO(synk): support non-contiguous vocab starts in the gather path
        #             (per-token rank search); fall back to the masked matmul path.
        path = "matmul"

    if path == "gather":
        return _forward_gather(ids_flat, stacked_weights, B, S, R, Vp, D,
                               gather_rows, vmem_cap)
    return _forward_matmul(ids_flat, stacked_weights, starts, B, S, R, Vp, D,
                           tm, vocab_block, gen, vmem_cap)


if __name__ == "__main__":
    # --- module config (synthetic, deterministic init) ---
    num_embeddings = 128       # vocabulary size
    embedding_dim = 128        # hidden size
    world_size = 2             # simulated tensor-model-parallel size
    B, S = 2, 8                # batch, sequence

    key = jax.random.PRNGKey(0)
    k_w, k_ids = jax.random.split(key)

    # xavier_normal_ on the master weight (num_embeddings, embedding_dim)
    std = math.sqrt(2.0 / (num_embeddings + embedding_dim))
    master_weight = std * jax.random.normal(
        k_w, (num_embeddings, embedding_dim), dtype=jnp.float32)
    master_bf16 = master_weight.astype(jnp.bfloat16)   # params_dtype = bf16

    # VocabUtility contiguous even split across ranks
    per_part = num_embeddings // world_size
    vocab_starts = jnp.arange(world_size, dtype=jnp.int32) * per_part
    stacked_weights = master_bf16.reshape(world_size, per_part, embedding_dim)

    ids = jax.random.randint(k_ids, (B, S), 0, num_embeddings, dtype=jnp.int32)

    # Reference: full-vocab lookup (== per-rank masked lookup + all-reduce)
    ref = jnp.take(master_bf16, ids, axis=0).astype(jnp.float32)

    for p in ("matmul", "gather", "auto"):
        out = vocab_parallel_embedding_forward(ids, stacked_weights, vocab_starts, path=p)
        out = jax.block_until_ready(out)
        assert out.shape == (B, S, embedding_dim), p
        assert out.dtype == jnp.bfloat16, p
        assert jnp.allclose(out.astype(jnp.float32), ref, atol=1e-6, rtol=0.0), p

    print("KERNEL_OK")
</pallas_src>

<mosaic_0001>
module attributes {stable_mosaic.version = 11 : i64} {
  func.func @_vocab_embed_matmul_kernel(%arg0: i32, %arg1: i32, %arg2: memref<2xi32, #tpu.memory_space<smem>>, %arg3: memref<128x1xi32, #tpu.memory_space<vmem>>, %arg4: memref<64x128xbf16, #tpu.memory_space<vmem>>, %arg5: memref<128x128xbf16, #tpu.memory_space<vmem>>) attributes {dimension_semantics = [#tpu.dimension_semantics<parallel>, #tpu.dimension_semantics<arbitrary>], iteration_bounds = array<i64: 1, 2>, scalar_prefetch = 1 : i64, scratch_operands = 0 : i64, tpu.core_type = #tpu.core_type<tc>, window_params = [{transform_indices = @transform_0, window_bounds = array<i64: 128, 1>}, {transform_indices = @transform_1, window_bounds = array<i64: 64, 128>}, {transform_indices = @transform_2, window_bounds = array<i64: 128, 128>}]} {
    %c0 = arith.constant 0 : index
    %c0_0 = arith.constant 0 : index
    %0 = vector.load %arg3[%c0, %c0_0] : memref<128x1xi32, #tpu.memory_space<vmem>>, vector<128x1xi32>
    %1 = arith.index_cast %arg1 : i32 to index
    %2 = memref.load %arg2[%1] : memref<2xi32, #tpu.memory_space<smem>>
    %3 = vector.broadcast %2 : i32 to vector<128x1xi32>
    %4 = arith.subi %0, %3 : vector<128x1xi32>
    %5 = tpu.iota {dimensions = array<i32: 1>} : vector<128x64xi32>
    %6 = vector.broadcast %4 : vector<128x1xi32> to vector<128x64xi32>
    %7 = arith.cmpi eq, %5, %6 : vector<128x64xi32>
    %8 = arith.extui %7 : vector<128x64xi1> to vector<128x64xi32>
    %9 = arith.sitofp %8 : vector<128x64xi32> to vector<128x64xf32>
    %10 = arith.truncf %9 : vector<128x64xf32> to vector<128x64xbf16>
    %c0_1 = arith.constant 0 : index
    %c0_2 = arith.constant 0 : index
    %11 = vector.load %arg4[%c0_1, %c0_2] : memref<64x128xbf16, #tpu.memory_space<vmem>>, vector<64x128xbf16>
    %cst = arith.constant dense<0.000000e+00> : vector<128x128xf32>
    %12 = tpu.matmul %10, %11, %cst {dimension_numbers = #tpu.dot_dimension_numbers<[1], [0], [0], [1], [0, 0, 1, 1], [], []>} : vector<128x64xbf16>, vector<64x128xbf16>, vector<128x128xf32> -> vector<128x128xf32>
    %c0_i32 = arith.constant 0 : i32
    %13 = arith.cmpi eq, %arg1, %c0_i32 : i32
    %14 = arith.extui %13 : i1 to i32
    %c0_i32_3 = arith.constant 0 : i32
    %15 = arith.cmpi ne, %14, %c0_i32_3 : i32
    scf.if %15 {
      %19 = arith.truncf %12 : vector<128x128xf32> to vector<128x128xbf16>
      %c0_6 = arith.constant 0 : index
      %c0_7 = arith.constant 0 : index
      %20 = vector.load %arg5[%c0_6, %c0_7] : memref<128x128xbf16, #tpu.memory_space<vmem>>, vector<128x128xbf16>
      tpu.vector_store %arg5[%c0_6, %c0_7], %19 {strides = array<i32>} : memref<128x128xbf16, #tpu.memory_space<vmem>>, vector<128x128xbf16>,
    } else {
    }
    %c0_i32_4 = arith.constant 0 : i32
    %16 = arith.cmpi sgt, %arg1, %c0_i32_4 : i32
    %17 = arith.extui %16 : i1 to i32
    %c0_i32_5 = arith.constant 0 : i32
    %18 = arith.cmpi ne, %17, %c0_i32_5 : i32
    scf.if %18 {
      %c0_6 = arith.constant 0 : index
      %c0_7 = arith.constant 0 : index
      %19 = vector.load %arg5[%c0_6, %c0_7] : memref<128x128xbf16, #tpu.memory_space<vmem>>, vector<128x128xbf16>
      %20 = arith.truncf %12 : vector<128x128xf32> to vector<128x128xbf16>
      %21 = arith.addf %19, %20 : vector<128x128xbf16>
      %c0_8 = arith.constant 0 : index
      %c0_9 = arith.constant 0 : index
      %22 = vector.load %arg5[%c0_8, %c0_9] : memref<128x128xbf16, #tpu.memory_space<vmem>>, vector<128x128xbf16>
      tpu.vector_store %arg5[%c0_8, %c0_9], %21 {strides = array<i32>} : memref<128x128xbf16, #tpu.memory_space<vmem>>, vector<128x128xbf16>,
    } else {
    }
    return
  }
  func.func @transform_0(%arg0: i32, %arg1: i32, %arg2: memref<2xi32, #tpu.memory_space<smem>>) -> (i32, i32) {
    %c0_i32 = arith.constant 0 : i32
    %c0_i32_0 = arith.constant 0 : i32
    return %arg0, %c0_i32 : i32, i32
  }
  func.func @transform_1(%arg0: i32, %arg1: i32, %arg2: memref<2xi32, #tpu.memory_space<smem>>) -> (i32, i32) {
    %c0_i32 = arith.constant 0 : i32
    %c0_i32_0 = arith.constant 0 : i32
    return %arg1, %c0_i32 : i32, i32
  }
  func.func @transform_2(%arg0: i32, %arg1: i32, %arg2: memref<2xi32, #tpu.memory_space<smem>>) -> (i32, i32) {
    %c0_i32 = arith.constant 0 : i32
    %c0_i32_0 = arith.constant 0 : i32
    return %arg0, %c0_i32 : i32, i32
  }
}

</mosaic_0001>

<bundles_post_ra>
// kernel: tpu_custom_call.1
= control target key start
LH: loop header
LB: loop body
LE: loop exit
PB: predicated region body
PF: predicated region fallthrough
CT: control target
= control target key end

     0   :  { %s1325_s0 = inlined_call_operand.vmem [shape: s32[2], index: 0, kind: input, shape index: {}]   ;;  %s1326_s1 = inlined_call_operand.vmem [shape: s32[128,1], index: 1, kind: input, shape index: {}]   ;;  %s1327_s2 = inlined_call_operand.vmem [shape: bf16[128,128], index: 2, kind: input, shape index: {}]   ;;  %s1328_s3 = inlined_call_operand.hbm [shape: bf16[128,128], index: 3, kind: output, shape index: {}]  }
   0x1   :  { %s8_s14 = sshll.u32 %s1325_s0, 4  ;;  %s9_s14 = int_to_ptr.vmem [resolvable:$true] %s8_s14 }
   0x2   :  { %s1044_s15 = scalar_lea.vmem %s9_s14, 16  ;;  %p1049_p1 = scmp.lt.s32.totalorder %s9_s14, %s9_s14 }
   0x3   :  { %p1045_p0 = scmp.ne.s32.totalorder %s9_s14, %s1044_s15  ;;  %p1050_p2 = scmp.lt.s32.totalorder %s1044_s15, %s1044_s15 }
   0x5   :  { %p1051_p3 = por %p1050_p2, %p1049_p1 }
   0x7   :  { %p1052_p4 = pnand %p1051_p3, %p1045_p0 }
   0x9   :  { %1055 = shalt.err (!%p1052_p4)  }
   0xa   :  { %s1110_s16 = smov [#allocation3]  }
   0xb   :  { %11 = dma.vmem_to_smem %s9_s14, 16, %s1110_s16, [#allocation2] }
   0xc   :  { %1092 = dma.done.wait [#allocation2], 16 }
   0xd   :  { %1093 = vsyncadd [#allocation2], 4294967280 }
   0xe   :  { %13 = sfence }
   0xf   :  { %14 = vsyncpa [#allocation5], 0  ;;  %s1139_s17 = smov 0   ;;  %s1141_s18 = smov 0  }
  0x10   :  { %s1143_s19 = smov 0  }
  0x11 LB: > { %s751_s0 = sadd.s32 4294967295, %s1108_s19   ;;  %s29_s20 = sadd.s32 1, %s1104_s18  ;;  %s1108_s19 = sphi %s1143_s19, %s20_s19   ;;  %s1104_s18 = sphi %s1141_s18, %s1331_s18   ;;  %s1100_s17 = sphi %s1139_s17, %s1330_s17  }
  0x12   : > { %p30_p5 = scmp.ge.s32.totalorder %s29_s20, 2  ;;  %p755_p6 = scmp.ge.s32.totalorder %s1108_s19, 1 }
  0x13   : > { %p144_p7 = scmp.lt.s32.totalorder %s1108_s19, 3 }
  0x14   : > { %s1333_s20 = smov (%p30_p5, %s29_s20), 0 }
  0x15   : > { %p145_p8 = pnand %p755_p6, %p144_p7 }
  0x16   : > { %s196_s21 = sld [smem:[#allocation3 + %s1100_s17]] (!%p145_p8)  ;;  %s756_s22 = sshll.u32 (!%p145_p8), %s1100_s17, 3 }
  0x17   : > { %148 = sbr.rel (%p145_p8) target bundleno = 431 (0x1af), region = 28  ;;  %p173_p9 = scmp.lt.s32.totalorder (!%p145_p8), %s756_s22, 15 }
  0x18   : > { %p786_p10 = scmp.ne.s32.totalorder (!%p145_p8), %s1100_s17, 0 }
  0x1c   : > { %v1111_v0 = vmov 0   ;;  %s1335_s22 = smov (!%p173_p9, %s756_s22), 15  ;;  %v188_v1 = vld [vmem:[%s1326_s1 + $0x40] sm:$0xff]  ;;  %v1168_v3 = vstv %s196_s21  ;;  %v189_v4 = vld [vmem:[%s1326_s1 + $0x48] sm:$0xff]  ;;  %v183_v12 = vld [vmem:[%s1326_s1 + $0x18] sm:$0xff]  ;;  %v214_v38 = vlaneseq  ;;  %vm352_vm4 = vcmask 523264  }
  0x1d   : > { %1039 = vset.pattern.permute.xlu1 %v1111_v0  ;;  %1038 = vset.pattern.permute.xlu0 %v1111_v0  ;;  %v180_v2 = vld [vmem:[%s1326_s1] sm:$0xff]  ;;  %s757_s27 = sshll.u32 %s1335_s22, 2  ;;  %v181_v5 = vld [vmem:[%s1326_s1 + $0x8] sm:$0xff]  ;;  %v206_v6 = vsub.s32 %v188_v1, %v1168_v3  ;;  %v207_v10 = vsub.s32 %v189_v4, %v1168_v3  ;;  %v182_v13 = vld [vmem:[%s1326_s1 + $0x10] sm:$0xff]  ;;  %v201_v15 = vsub.s32 %v183_v12, %v1168_v3  ;;  %v1112_v44 = vmov 0.0  }
  0x1e   : > { %s176_s7 = scalar_lea.vmem %s1327_s2, %s757_s27  ;;  %v198_v7 = vsub.s32 %v180_v2, %v1168_v3  ;;  %v199_v11 = vsub.s32 %v181_v5, %v1168_v3  ;;  %v200_v16 = vsub.s32 %v182_v13, %v1168_v3  ;;  %v191_v17 = vld [vmem:[%s1326_s1 + $0x58] sm:$0xff]  ;;  %v190_v18 = vld [vmem:[%s1326_s1 + $0x50] sm:$0xff]  ;;  %v185_v22 = vld [vmem:[%s1326_s1 + $0x28] sm:$0xff]  ;;  %v1231_v39 = vand.u32 127, %v214_v38 }
  0x1f   : > { %v1040_v8 = vld [vmem:[%s176_s7 + $0x18] sm:$0xff]   ;;  %v1041_v9 = vld [vmem:[%s176_s7 + $0x10] sm:$0xff]   ;;  %241 = vperm.xlu1 %1039, %v206_v6   ;;  %v1042_v14 = vld [vmem:[%s176_s7 + $0x8] sm:$0xff]   ;;  %v209_v20 = vsub.s32 %v191_v17, %v1168_v3  ;;  %v208_v21 = vsub.s32 %v190_v18, %v1168_v3  ;;  %v203_v24 = vsub.s32 %v185_v22, %v1168_v3 }
  0x20   : > { %217 = vperm.xlu0 %1038, %v198_v7   ;;  %970 = vmatprep.subr.bf16.mxu0 %v1040_v8  ;;  %v1043_v19 = vld [vmem:[%s176_s7] sm:$0xff]   ;;  %v193_v26 = vld [vmem:[%s1326_s1 + $0x68] sm:$0xff]  ;;  %v187_v30 = vld [vmem:[%s1326_s1 + $0x38] sm:$0xff] }
  0x21   : > { %971 = vmatpush3.bf16.msra.mxu0 %v1040_v8  ;;  %994 = vmatprep.subr.bf16.mxu1 %v1040_v8  ;;  %v184_v23 = vld [vmem:[%s1326_s1 + $0x20] sm:$0xff]  ;;  %v211_v28 = vsub.s32 %v193_v26, %v1168_v3  ;;  %v186_v31 = vld [vmem:[%s1326_s1 + $0x30] sm:$0xff]  ;;  %v205_v32 = vsub.s32 %v187_v30, %v1168_v3  ;;  %v195_v34 = vld [vmem:[%s1326_s1 + $0x78] sm:$0xff] }
  0x22   : > { %972 = vmatprep.subr.bf16.mxu0 %v1041_v9  ;;  %998 = vmatpush3.bf16.msra.mxu1 %v1040_v8  ;;  %v202_v25 = vsub.s32 %v184_v23, %v1168_v3  ;;  %v192_v27 = vld [vmem:[%s1326_s1 + $0x60] sm:$0xff]  ;;  %v204_v33 = vsub.s32 %v186_v31, %v1168_v3  ;;  %v194_v35 = vld [vmem:[%s1326_s1 + $0x70] sm:$0xff]  ;;  %v213_v36 = vsub.s32 %v195_v34, %v1168_v3 }
  0x23   : > { %244 = vperm.xlu1 %1039, %v207_v10   ;;  %995 = vmatprep.subr.bf16.mxu1 %v1041_v9  ;;  %v210_v29 = vsub.s32 %v192_v27, %v1168_v3  ;;  %v212_v37 = vsub.s32 %v194_v35, %v1168_v3 }
  0x24   : > { %220 = vperm.xlu0 %1038, %v199_v11  }
  0x25   : > { %973 = vmatpush3.bf16.msra.mxu0 %v1041_v9 }
  0x26   : > { %974 = vmatprep.subr.bf16.mxu0 %v1042_v14  ;;  %999 = vmatpush3.bf16.msra.mxu1 %v1041_v9 }
  0x27   : > { %226 = vperm.xlu1 %1039, %v201_v15   ;;  %996 = vmatprep.subr.bf16.mxu1 %v1042_v14 }
  0x28   : > { %223 = vperm.xlu0 %1038, %v200_v16  }
  0x29   : > { %975 = vmatpush3.bf16.msra.mxu0 %v1042_v14 }
  0x2a   : > { %976 = vmatprep.subr.bf16.mxu0 %v1043_v19  ;;  %1000 = vmatpush3.bf16.msra.mxu1 %v1042_v14 }
  0x2b   : > { %250 = vperm.xlu1 %1039, %v209_v20   ;;  %997 = vmatprep.subr.bf16.mxu1 %v1043_v19 }
  0x2c   : > { %247 = vperm.xlu0 %1038, %v208_v21  }
  0x2d   : > { %977 = vmatpush3.bf16.msra.mxu0 %v1043_v19 }
  0x2e   : > { %1001 = vmatpush3.bf16.msra.mxu1 %v1043_v19 }
  0x2f   : > { %232 = vperm.xlu1 %1039, %v203_v24  }
  0x30   : > { %229 = vperm.xlu0 %1038, %v202_v25  }
  0x33   : > { %256 = vperm.xlu1 %1039, %v211_v28  }
  0x34   : > { %253 = vperm.xlu0 %1038, %v210_v29  }
  0x37   : > { %238 = vperm.xlu1 %1039, %v205_v32  }
  0x38   : > { %235 = vperm.xlu0 %1038, %v204_v33  }
  0x3b   : > { %262 = vperm.xlu1 %1039, %v213_v36  }
  0x3c   : > { %259 = vperm.xlu0 %1038, %v212_v37  }
  0x9a   : > { %v242_v40 = vpop.permute.xlu1 %241 }
  0x9b   : > { %v218_v41 = vpop.permute.xlu0 %217  ;;  %vm272_vm0 = vcmp.eq.s32.totalorder %v1231_v39, %v242_v40 }
  0x9c   : > { %vm264_vm1 = vcmp.eq.s32.totalorder %v1231_v39, %v218_v41  ;;  %v766_v45 = vsel %vm272_vm0, 1.0, %v1112_v44 }
  0x9d   : > { %v758_v46 = vsel %vm264_vm1, 1.0, %v1112_v44 }
  0x9e   : > { %v245_v42 = vpop.permute.xlu1 %244 }
  0x9f   : > { %v221_v43 = vpop.permute.xlu0 %220  ;;  %vm273_vm2 = vcmp.eq.s32.totalorder %v1231_v39, %v245_v42 }
  0xa0   : > { %vm265_vm3 = vcmp.eq.s32.totalorder %v1231_v39, %v221_v43  ;;  %v767_v47 = vsel %vm273_vm2, 1.0, %v1112_v44 }
  0xa1   : > { %v759_v48 = vsel %vm265_vm3, 1.0, %v1112_v44  ;;  %v316_v50 = vpack.c.bf16 %v767_v47, %v766_v45 }
  0xa2   : > { %v312_v49 = vpack.c.bf16 %v759_v48, %v758_v46  ;;  %v227_v51 = vpop.permute.xlu1 %226 }
  0xa3   : > { %v224_v52 = vpop.permute.xlu0 %223  ;;  %vm267_vm5 = vcmp.eq.s32.totalorder %v1231_v39, %v227_v51  ;;  %986 = vmatprep.mubr.msk.bf16.mxu1 %vm352_vm4, %v316_v50 }
  0xa4   : > { %vm266_vm6 = vcmp.eq.s32.totalorder %v1231_v39, %v224_v52  ;;  %978 = vmatprep.mubr.msk.bf16.mxu0 %vm352_vm4, %v312_v49  ;;  %v761_v53 = vsel %vm267_vm5, 1.0, %v1112_v44 }
  0xa5   : > { %v760_v54 = vsel %vm266_vm6, 1.0, %v1112_v44 }
  0xa6   : > { %v313_v55 = vpack.c.bf16 %v761_v53, %v760_v54  ;;  %v251_v56 = vpop.permute.xlu1 %250 }
  0xa7   : > { %v248_v57 = vpop.permute.xlu0 %247  ;;  %vm275_vm7 = vcmp.eq.s32.totalorder %v1231_v39, %v251_v56 }
  0xa8   : > { %vm274_vm8 = vcmp.eq.s32.totalorder %v1231_v39, %v248_v57  ;;  %979 = vmatmul.mubr.msk.bf16.vlgmr.msra.gmra.mxu0 %vm352_vm4, %v313_v55  ;;  %v769_v58 = vsel %vm275_vm7, 1.0, %v1112_v44 }
  0xa9   : > { %v768_v59 = vsel %vm274_vm8, 1.0, %v1112_v44 }
  0xaa   : > { %v317_v60 = vpack.c.bf16 %v769_v58, %v768_v59  ;;  %v233_v61 = vpop.permute.xlu1 %232 }
  0xab   : > { %v230_v62 = vpop.permute.xlu0 %229  ;;  %vm269_vm9 = vcmp.eq.s32.totalorder %v1231_v39, %v233_v61 }
  0xac   : > { %vm268_vm10 = vcmp.eq.s32.totalorder %v1231_v39, %v230_v62  ;;  %987 = vmatmul.mubr.msk.bf16.vlgmr.msra.gmra.mxu1 %vm352_vm4, %v317_v60  ;;  %v763_v63 = vsel %vm269_vm9, 1.0, %v1112_v44 }
  0xad   : > { %v762_v0 = vsel %vm268_vm10, 1.0, %v1112_v44 }
  0xae   : > { %v314_v1 = vpack.c.bf16 %v763_v63, %v762_v0  ;;  %v257_v2 = vpop.permute.xlu1 %256 }
  0xaf   : > { %v254_v3 = vpop.permute.xlu0 %253  ;;  %vm277_vm11 = vcmp.eq.s32.totalorder %v1231_v39, %v257_v2 }
  0xb0   : > { %vm276_vm12 = vcmp.eq.s32.totalorder %v1231_v39, %v254_v3  ;;  %982 = vmatprep.mubr.msk.bf16.mxu0 %vm352_vm4, %v314_v1  ;;  %v771_v4 = vsel %vm277_vm11, 1.0, %v1112_v44 }
  0xb1   : > { %v770_v5 = vsel %vm276_vm12, 1.0, %v1112_v44 }
  0xb2   : > { %v318_v6 = vpack.c.bf16 %v771_v4, %v770_v5  ;;  %v239_v7 = vpop.permute.xlu1 %238 }
  0xb3   : > { %v236_v8 = vpop.permute.xlu0 %235  ;;  %vm271_vm13 = vcmp.eq.s32.totalorder %v1231_v39, %v239_v7 }
  0xb4   : > { %vm270_vm14 = vcmp.eq.s32.totalorder %v1231_v39, %v236_v8  ;;  %990 = vmatprep.mubr.msk.bf16.mxu1 %vm352_vm4, %v318_v6  ;;  %v765_v9 = vsel %vm271_vm13, 1.0, %v1112_v44 }
  0xb5   : > { %v764_v10 = vsel %vm270_vm14, 1.0, %v1112_v44 }
  0xb6   : > { %v315_v11 = vpack.c.bf16 %v765_v9, %v764_v10  ;;  %v263_v12 = vpop.permute.xlu1 %262 }
  0xb7   : > { %v260_v13 = vpop.permute.xlu0 %259  ;;  %vm279_vm15 = vcmp.eq.s32.totalorder %v1231_v39, %v263_v12 }
  0xb8   : > { %vm278_vm0 = vcmp.eq.s32.totalorder %v1231_v39, %v260_v13  ;;  %983 = vmatmul.mubr.msk.bf16.gmra.mxu0 %vm352_vm4, %v315_v11  ;;  %v773_v14 = vsel %vm279_vm15, 1.0, %v1112_v44 }
  0xb9   : > { %v772_v15 = vsel %vm278_vm0, 1.0, %v1112_v44 }
  0xba   : > { %v319_v16 = vpack.c.bf16 %v773_v14, %v772_v15 }
  0xbc   : > { %991 = vmatmul.mubr.msk.bf16.gmra.mxu1 %vm352_vm4, %v319_v16 }
 0x168   : > { %v980_v17 = vpop.f32.mrf.mxu0 }
 0x16a   : > { %v411_v18 = vpop.f32.mrf.mxu0 }
 0x16c   : > { %v981_v19 = vpop.f32.mrf.mxu0  ;;  %v1257_v20 = vpop.f32.mrf.mxu1 }
 0x16e   : > { %v414_v21 = vpop.f32.mrf.mxu0  ;;  %v1259_v22 = vpop.f32.mrf.mxu1 }
 0x170   : > { %v1261_v23 = vpop.f32.mrf.mxu1 }
 0x172   : > { %v1263_v24 = vpop.f32.mrf.mxu1 }
 0x178   : > { %v984_v25 = vpop.f32.mrf.mxu0 }
 0x17a   : > { %v427_v26 = vpop.f32.mrf.mxu0 }
 0x17c   : > { %v985_v27 = vpop.f32.mrf.mxu0  ;;  %v1265_v28 = vpop.f32.mrf.mxu1 }
 0x17e   : > { %v430_v29 = vpop.f32.mrf.mxu0  ;;  %v1267_v30 = vpop.f32.mrf.mxu1  ;;  %477 = sbr.rel (%p786_p10) target bundleno = 393 (0x189), region = 32 }
 0x180   : > { %v1269_v31 = vpop.f32.mrf.mxu1 }
 0x182   : > { %v1271_v32 = vpop.f32.mrf.mxu1 }
 0x183   : > { %v859_v33 = vpack.c.bf16 %v414_v21, %v411_v18  ;;  %v864_v34 = vpack.c.bf16 %v981_v19, %v980_v17  ;;  %v869_v35 = vpack.c.bf16 %v430_v29, %v427_v26  ;;  %v874_v36 = vpack.c.bf16 %v985_v27, %v984_v25 }
 0x184   : > { %v879_v37 = vpack.c.bf16 %v1263_v24, %v1259_v22  ;;  %v884_v38 = vpack.c.bf16 %v1261_v23, %v1257_v20  ;;  %v889_v39 = vpack.c.bf16 %v1271_v32, %v1267_v30  ;;  %v894_v40 = vpack.c.bf16 %v1269_v31, %v1265_v28 }
 0x185   : > { %860 = vst [vmem:[#allocation4] sm:$0xff] %v859_v33   ;;  %936 = vst [vmem:[#allocation4 + $0x8] sm:$0xff] %v864_v34  }
 0x186   : > { %937 = vst [vmem:[#allocation4 + $0x10] sm:$0xff] %v869_v35   ;;  %938 = vst [vmem:[#allocation4 + $0x18] sm:$0xff] %v874_v36  }
 0x187   : > { %939 = vst [vmem:[#allocation4 + $0x20] sm:$0xff] %v879_v37   ;;  %940 = vst [vmem:[#allocation4 + $0x28] sm:$0xff] %v884_v38  }
 0x188   : > { %941 = vst [vmem:[#allocation4 + $0x30] sm:$0xff] %v889_v39   ;;  %942 = vst [vmem:[#allocation4 + $0x38] sm:$0xff] %v894_v40  }
 0x189 PF: > { %p803_p11 = scmp.le.s32.totalorder %s1100_s17, 0 }
 0x18b   : > { %561 = sbr.rel (%p803_p11) target bundleno = 415 (0x19f), region = 36 }
 0x190   : > { %v562_v41 = vld [vmem:[#allocation4] sm:$0xf]  ;;  %v563_v42 = vld [vmem:[#allocation4 + $0x4] sm:$0xf]  ;;  %v840_v43 = vpack.c.bf16 %v411_v18, %v411_v18  ;;  %v841_v44 = vpack.c.bf16 %v414_v21, %v414_v21  ;;  %v564_v45 = vld [vmem:[#allocation4 + $0x8] sm:$0xf]  ;;  %v842_v46 = vpack.c.bf16 %v980_v17, %v980_v17  ;;  %v843_v47 = vpack.c.bf16 %v981_v19, %v981_v19 }
 0x191   : > { %v565_v48 = vld [vmem:[#allocation4 + $0xc] sm:$0xf]  ;;  %v566_v49 = vld [vmem:[#allocation4 + $0x10] sm:$0xf]  ;;  %v567_v50 = vld [vmem:[#allocation4 + $0x14] sm:$0xf]  ;;  %v844_v51 = vpack.c.bf16 %v427_v26, %v427_v26  ;;  %v845_v52 = vpack.c.bf16 %v430_v29, %v430_v29  ;;  %v846_v53 = vpack.c.bf16 %v984_v25, %v984_v25  ;;  %v847_v54 = vpack.c.bf16 %v985_v27, %v985_v27 }
 0x192   : > { %v642_v55 = vadd.bf16 %v840_v43, %v562_v41  ;;  %v643_v56 = vadd.bf16 %v841_v44, %v563_v42  ;;  %v644_v57 = vadd.bf16 %v842_v46, %v564_v45  ;;  %v645_v58 = vadd.bf16 %v843_v47, %v565_v48  ;;  %v568_v59 = vld [vmem:[#allocation4 + $0x18] sm:$0xf]  ;;  %v569_v60 = vld [vmem:[#allocation4 + $0x1c] sm:$0xf]  ;;  %v570_v1 = vld [vmem:[#allocation4 + $0x20] sm:$0xf] }
 0x193   : > { %v646_v61 = vadd.bf16 %v844_v51, %v566_v49  ;;  %v647_v62 = vadd.bf16 %v845_v52, %v567_v50  ;;  %v648_v63 = vadd.bf16 %v846_v53, %v568_v59  ;;  %v649_v0 = vadd.bf16 %v847_v54, %v569_v60  ;;  %v571_v2 = vld [vmem:[#allocation4 + $0x24] sm:$0xf]  ;;  %v572_v7 = vld [vmem:[#allocation4 + $0x28] sm:$0xf]  ;;  %v573_v8 = vld [vmem:[#allocation4 + $0x2c] sm:$0xf] }
 0x194   : > { %v943_v3 = vcombine.low %v642_v55, %v643_v56  ;;  %v944_v4 = vcombine.low %v644_v57, %v645_v58  ;;  %v848_v5 = vpack.c.bf16 %v1259_v22, %v1259_v22  ;;  %v849_v6 = vpack.c.bf16 %v1263_v24, %v1263_v24  ;;  %v574_v13 = vld [vmem:[#allocation4 + $0x30] sm:$0xf]  ;;  %v575_v14 = vld [vmem:[#allocation4 + $0x34] sm:$0xf]  ;;  %v576_v19 = vld [vmem:[#allocation4 + $0x38] sm:$0xf] }
 0x195   : > { %v946_v9 = vcombine.low %v646_v61, %v647_v62  ;;  %v948_v10 = vcombine.low %v648_v63, %v649_v0  ;;  %v850_v11 = vpack.c.bf16 %v1257_v20, %v1257_v20  ;;  %v851_v12 = vpack.c.bf16 %v1261_v23, %v1261_v23  ;;  %v577_v21 = vld [vmem:[#allocation4 + $0x3c] sm:$0xf] }
 0x196   : > { %900 = vst [vmem:[#allocation4] sm:$0xff] %v943_v3   ;;  %945 = vst [vmem:[#allocation4 + $0x8] sm:$0xff] %v944_v4   ;;  %v650_v15 = vadd.bf16 %v848_v5, %v570_v1  ;;  %v651_v16 = vadd.bf16 %v849_v6, %v571_v2  ;;  %v852_v17 = vpack.c.bf16 %v1267_v30, %v1267_v30 }
 0x197   : > { %v853_v18 = vpack.c.bf16 %v1271_v32, %v1271_v32  ;;  %947 = vst [vmem:[#allocation4 + $0x10] sm:$0xff] %v946_v9   ;;  %949 = vst [vmem:[#allocation4 + $0x18] sm:$0xff] %v948_v10   ;;  %v652_v20 = vadd.bf16 %v850_v11, %v572_v7  ;;  %v653_v22 = vadd.bf16 %v851_v12, %v573_v8 }
 0x198   : > { %v854_v23 = vpack.c.bf16 %v1265_v28, %v1265_v28  ;;  %v855_v24 = vpack.c.bf16 %v1269_v31, %v1269_v31  ;;  %v950_v25 = vcombine.low %v650_v15, %v651_v16  ;;  %v654_v26 = vadd.bf16 %v852_v17, %v574_v13 }
 0x199   : > { %v655_v27 = vadd.bf16 %v853_v18, %v575_v14  ;;  %v952_v29 = vcombine.low %v652_v20, %v653_v22 }
 0x19a   : > { %v656_v30 = vadd.bf16 %v854_v23, %v576_v19  ;;  %v657_v33 = vadd.bf16 %v855_v24, %v577_v21  ;;  %951 = vst [vmem:[#allocation4 + $0x20] sm:$0xff] %v950_v25  }
 0x19b   : > { %v954_v32 = vcombine.low %v654_v26, %v655_v27  ;;  %953 = vst [vmem:[#allocation4 + $0x28] sm:$0xff] %v952_v29  }
 0x19c   : > { %v956_v34 = vcombine.low %v656_v30, %v657_v33 }
 0x19d   : > { %955 = vst [vmem:[#allocation4 + $0x30] sm:$0xff] %v954_v32  }
 0x19e   : > { %957 = vst [vmem:[#allocation4 + $0x38] sm:$0xff] %v956_v34  }
 0x19f PF: > { %p1301_p12 = scmp.eq.s32.totalorder %s751_s0, 1  ;;  %s1113_s9 = smov [#allocation4]  }
 0x1a0   : > { %s683_s10 = sshll.u32 %s1113_s9, 4  ;;  %s684_s10 = int_to_ptr.vmem [resolvable:$true] %s683_s10 }
 0x1a1   : > { %s1056_s11 = scalar_lea.vmem %s684_s10, 1024  ;;  %p1063_p2 = scmp.lt.s32.totalorder %s684_s10, %s684_s10 }
 0x1a2   : > { %p1057_p13 = scmp.ne.s32.totalorder %s684_s10, %s1056_s11  ;;  %p1064_p3 = scmp.lt.s32.totalorder %s1056_s11, %s1056_s11 }
 0x1a4   : > { %p1058_p0 = pnand %p1057_p13, %p1301_p12  ;;  %p1065_p4 = por %p1064_p3, %p1063_p2 }
 0x1a6   : > { %p1059_p1 = pneg %p1058_p0 }
 0x1a8   : > { %p1066_p5 = pnand %p1065_p4, %p1059_p1 }
 0x1aa   : > { %1069 = shalt.err (!%p1066_p5)
}
 0x1ab   : > { %s1114_s12 = smov 64   ;;  %s1115_s0 = smov 4  }
 0x1ac   : > { %1003 = dma.vmem_to_hbm [thread:$0]  (%p1301_p12), %s684_s10, 1024, %s1328_s3, [#allocation5], %s1114_s12, %s1114_s12, %s1115_s0  }
 0x1ad   : > { %1095 = dma.done.wait (%p1301_p12), [#allocation5], 1024  }
 0x1ae   : > { %1097 = vsyncadd (%p1301_p12), [#allocation5], 4294966272 }
 0x1af PF: > { %s20_s19 = sadd.s32 1, %s1108_s19   ;;  %s1330_s17 = smov %s1104_s18 }
 0x1b0   : > { %p17_p6 = scmp.ge.s32.totalorder %s20_s19, 4   ;;  %s1331_s18 = smov %s1333_s20 }
 0x1b2   :  { %19 = sbr.rel (!%p17_p6) target bundleno = 17 (0x11), region = 67 }
 0x1b7   :  { %699 = vsyncpa [#allocation5], 1 }
 0x1b8   :  { %701 = vsyncpa [#allocation5 + $0x1], 1 }

</bundles_post_ra>
